<compile_context>
chip_gen: v6e
topology: v6e:2x2x1
jax: 0.10.0
libtpu: 0.0.40
codegen_flags: <defaults>
</compile_context>

<pallas_src>
import functools

import jax
import jax.numpy as jnp
from jax.experimental import pallas as pl
from jax.experimental.pallas import tpu as pltpu

# ------------------------- model hyper-parameters -------------------------
N_EMBD = 32      # C
BLOCK_SIZE = 8   # max T (== T here)
HEAD_SIZE = 8    # D
NUM_HEADS = 4    # H   (H * D == C)
DROPOUT = 0.0    # eval-mode dropout == identity
BATCH = 2
SEQ = BLOCK_SIZE

# Finite large-negative mask value. Safe here because every row has at least one
# valid key (the diagonal); fully-padded rows would yield a uniform distribution
# over masked keys instead of NaN.
NEG_INF = -1e30


def _mha_kernel(x_ref, wqkv_ref, wo_ref, bo_ref, mask_ref, o_ref, *,
                num_heads, head_size):
    """One batch element of causal multi-head attention.

    x_ref   : (T, C)        f32  activations for this batch element
    wqkv_ref: (C, 3*H*D)    bf16 fused [Wq | Wk | Wv] projection weights
    wo_ref  : (H*D, C)      bf16 output projection
    bo_ref  : (1, C)        f32  output projection bias
    mask_ref: (T, T)        f32  additive causal bias (0 on/below diag, -1e30 above)
    o_ref   : (T, C)        f32
    """
    H, D = num_heads, head_size
    scale = float(head_size) ** -0.5

    # --- fused QKV projection: one lane-dense (T,C)@(C,3HD) matmul on the MXU ---
    xb = x_ref[...].astype(jnp.bfloat16)                               # (T, C)
    qkv = jnp.dot(xb, wqkv_ref[...],
                  preferred_element_type=jnp.float32)                  # (T, 3HD) f32

    mask_bias = mask_ref[...]                                          # (T, T) f32

    # --- per-head attention (H=4, statically unrolled; static lane slices) ---
    head_outs = []
    for h in range(H):
        qh = qkv[:, h * D:(h + 1) * D].astype(jnp.bfloat16)            # (T, D)
        kh = qkv[:, (H + h) * D:(H + h + 1) * D].astype(jnp.bfloat16)  # (T, D)
        vh = qkv[:, (2 * H + h) * D:(2 * H + h + 1) * D].astype(jnp.bfloat16)

        # q @ k^T via contracting-dim dot_general (no explicit transpose).
        s = jax.lax.dot_general(qh, kh, (((1,), (1,)), ((), ())),
                                preferred_element_type=jnp.float32)    # (T, T) f32
        s = s * scale + mask_bias

        # softmax in f32; the divide runs on the EUP via approx reciprocal.
        m = jnp.max(s, axis=-1, keepdims=True)
        e = jnp.exp(s - m)
        denom = jnp.sum(e, axis=-1, keepdims=True)
        p = e * pl.reciprocal(denom, approx=True)                      # (T, T) f32
        # TODO(synk): attention-weight dropout skipped (eval mode / p = 0.0)

        head_outs.append(jnp.dot(p.astype(jnp.bfloat16), vh,
                                 preferred_element_type=jnp.float32))  # (T, D) f32

    # --- head concat + output projection in ONE matmul (reduction in the MXU) ---
    att = jnp.concatenate(head_outs, axis=-1).astype(jnp.bfloat16)     # (T, H*D)
    y = jnp.dot(att, wo_ref[...],
                preferred_element_type=jnp.float32) + bo_ref[...]      # (T, C) f32
    # TODO(synk): output dropout skipped (eval mode / p = 0.0)

    o_ref[...] = y.astype(o_ref.dtype)


def multi_head_attention(x, wq, wk, wv, wo, bo, *, num_heads, head_size):
    """x: (B, T, C) f32; wq/wk/wv: (C, H*D); wo: (H*D, C); bo: (1, C)."""
    B, T, C = x.shape
    H, D = num_heads, head_size
    HD = H * D

    # Wrapper-side (XLA) layout plumbing so the kernel only sees lane-dense slabs:
    #   * fuse Q/K/V weights into one (C, 3*H*D) matrix (column blocks are already
    #     head-major, matching the reference's reshape(B,T,H,D)),
    #   * cast weights to bf16 (MXU-native on all generations),
    #   * precompute the additive causal-mask bias.
    x2d = x.reshape(B * T, C)
    wqkv2d = jnp.concatenate([wq, wk, wv], axis=1).astype(jnp.bfloat16)   # (C, 3HD)
    wo_bf = wo.astype(jnp.bfloat16)                                       # (HD, C)
    tril = jnp.tril(jnp.ones((T, T), dtype=bool))
    mask_bias = jnp.where(tril, 0.0, NEG_INF).astype(jnp.float32)         # (T, T)

    kernel = functools.partial(_mha_kernel, num_heads=H, head_size=D)

    y2d = pl.pallas_call(
        kernel,
        out_shape=jax.ShapeDtypeStruct((B * T, C), x.dtype),
        grid=(B,),
        in_specs=[
            pl.BlockSpec((T, C), lambda b: (b, 0)),          # x: one batch row-block
            pl.BlockSpec((C, 3 * HD), lambda b: (0, 0)),     # Wqkv: resident
            pl.BlockSpec((HD, C), lambda b: (0, 0)),         # Wo:   resident
            pl.BlockSpec((1, C), lambda b: (0, 0)),          # bias: resident
            pl.BlockSpec((T, T), lambda b: (0, 0)),          # mask: resident
        ],
        out_specs=pl.BlockSpec((T, C), lambda b: (b, 0)),
        compiler_params=pltpu.CompilerParams(
            dimension_semantics=("parallel",)),              # megacore on v7x
    )(x2d, wqkv2d, wo_bf, bo, mask_bias)
    return y2d.reshape(B, T, C)


def _reference(x, wq, wk, wv, wo, bo, *, num_heads, head_size):
    """Pure-JAX f32 reference mirroring the PyTorch forward (eval mode)."""
    B, T, C = x.shape
    q = x @ wq
    k = x @ wk
    v = x @ wv
    q = q.reshape(B, T, num_heads, head_size).transpose(0, 2, 1, 3)
    k = k.reshape(B, T, num_heads, head_size).transpose(0, 2, 1, 3)
    v = v.reshape(B, T, num_heads, head_size).transpose(0, 2, 1, 3)
    wei = jnp.einsum("bhqd,bhkd->bhqk", q, k) * head_size ** (-0.5)
    mask = jnp.tril(jnp.ones((T, T), bool))
    wei = jnp.where(mask, wei, -jnp.inf)
    wei = jax.nn.softmax(wei, axis=-1)
    out = jnp.einsum("bhqk,bhkd->bhqd", wei, v)
    out = out.transpose(0, 2, 1, 3).reshape(B, T, num_heads * head_size)
    return out @ wo + bo


if __name__ == "__main__":
    key = jax.random.PRNGKey(0)
    kx, kq, kk, kv, ko, kb = jax.random.split(key, 6)

    HD = NUM_HEADS * HEAD_SIZE
    x = jax.random.normal(kx, (BATCH, SEQ, N_EMBD), jnp.float32)

    # Parameter init (shapes follow the PyTorch module):
    #   per-head key/query/value Linear(n_embd, head_size, bias=False),
    #   stacked across heads and pre-transposed to (C, H*D); proj pre-transposed.
    wq = jax.random.normal(kq, (N_EMBD, HD), jnp.float32) * 0.1
    wk = jax.random.normal(kk, (N_EMBD, HD), jnp.float32) * 0.1
    wv = jax.random.normal(kv, (N_EMBD, HD), jnp.float32) * 0.1
    wo = jax.random.normal(ko, (HD, N_EMBD), jnp.float32) * 0.1
    bo = jax.random.normal(kb, (1, N_EMBD), jnp.float32) * 0.1

    out = multi_head_attention(x, wq, wk, wv, wo, bo,
                               num_heads=NUM_HEADS, head_size=HEAD_SIZE)
    out = jax.block_until_ready(out)

    ref = _reference(x, wq, wk, wv, wo, bo,
                     num_heads=NUM_HEADS, head_size=HEAD_SIZE)
    assert out.shape == (BATCH, SEQ, N_EMBD)
    # tolerance covers bf16 MXU operands (f32 accumulation) and the approx (EUP)
    # reciprocal in the softmax denominator vs the pure-f32 reference
    assert jnp.allclose(out, ref, atol=3e-2, rtol=3e-2), "mismatch vs reference"

    print("KERNEL_OK")
</pallas_src>

<mosaic_0001>
module attributes {stable_mosaic.version = 11 : i64} {
  func.func @_mha_kernel(%arg0: i32, %arg1: memref<8x32xf32, #tpu.memory_space<vmem>>, %arg2: memref<32x96xbf16, #tpu.memory_space<vmem>>, %arg3: memref<32x32xbf16, #tpu.memory_space<vmem>>, %arg4: memref<1x32xf32, #tpu.memory_space<vmem>>, %arg5: memref<8x8xf32, #tpu.memory_space<vmem>>, %arg6: memref<8x32xf32, #tpu.memory_space<vmem>>) attributes {dimension_semantics = [#tpu.dimension_semantics<parallel>], iteration_bounds = array<i64: 2>, scalar_prefetch = 0 : i64, scratch_operands = 0 : i64, tpu.core_type = #tpu.core_type<tc>, window_params = [{transform_indices = @transform_0, window_bounds = array<i64: 8, 32>}, {pipeline_mode = #tpu.pipeline_mode<synchronous>, transform_indices = @transform_1, window_bounds = array<i64: 32, 96>}, {pipeline_mode = #tpu.pipeline_mode<synchronous>, transform_indices = @transform_2, window_bounds = array<i64: 32, 32>}, {pipeline_mode = #tpu.pipeline_mode<synchronous>, transform_indices = @transform_3, window_bounds = array<i64: 1, 32>}, {pipeline_mode = #tpu.pipeline_mode<synchronous>, transform_indices = @transform_4, window_bounds = array<i64: 8, 8>}, {transform_indices = @transform_5, window_bounds = array<i64: 8, 32>}]} {
    %c0 = arith.constant 0 : index
    %c0_0 = arith.constant 0 : index
    %0 = vector.load %arg1[%c0, %c0_0] : memref<8x32xf32, #tpu.memory_space<vmem>>, vector<8x32xf32>
    %1 = arith.truncf %0 : vector<8x32xf32> to vector<8x32xbf16>
    %c0_1 = arith.constant 0 : index
    %c0_2 = arith.constant 0 : index
    %2 = vector.load %arg2[%c0_1, %c0_2] : memref<32x96xbf16, #tpu.memory_space<vmem>>, vector<32x96xbf16>
    %cst = arith.constant dense<0.000000e+00> : vector<8x96xf32>
    %3 = tpu.matmul %1, %2, %cst {dimension_numbers = #tpu.dot_dimension_numbers<[1], [0], [0], [1], [0, 0, 1, 1], [], []>} : vector<8x32xbf16>, vector<32x96xbf16>, vector<8x96xf32> -> vector<8x96xf32>
    %c0_3 = arith.constant 0 : index
    %c0_4 = arith.constant 0 : index
    %4 = vector.load %arg5[%c0_3, %c0_4] : memref<8x8xf32, #tpu.memory_space<vmem>>, vector<8x8xf32>
    %5 = vector.extract_strided_slice %3 {offsets = [0, 0], sizes = [8, 8], strides = [1, 1]} : vector<8x96xf32> to vector<8x8xf32>
    %6 = arith.truncf %5 : vector<8x8xf32> to vector<8x8xbf16>
    %7 = vector.extract_strided_slice %3 {offsets = [0, 32], sizes = [8, 8], strides = [1, 1]} : vector<8x96xf32> to vector<8x8xf32>
    %8 = arith.truncf %7 : vector<8x8xf32> to vector<8x8xbf16>
    %9 = vector.extract_strided_slice %3 {offsets = [0, 64], sizes = [8, 8], strides = [1, 1]} : vector<8x96xf32> to vector<8x8xf32>
    %10 = arith.truncf %9 : vector<8x8xf32> to vector<8x8xbf16>
    %cst_5 = arith.constant dense<0.000000e+00> : vector<8x8xf32>
    %11 = tpu.matmul %6, %8, %cst_5 {dimension_numbers = #tpu.dot_dimension_numbers<[1], [1], [0], [0], [0, 0, 1, 0], [], []>} : vector<8x8xbf16>, vector<8x8xbf16>, vector<8x8xf32> -> vector<8x8xf32>
    %cst_6 = arith.constant 0.353553385 : f32
    %12 = vector.broadcast %cst_6 : f32 to vector<8x8xf32>
    %13 = arith.mulf %11, %12 : vector<8x8xf32>
    %14 = arith.addf %13, %4 : vector<8x8xf32>
    %cst_7 = arith.constant dense<0xFF800000> : vector<8xf32>
    %15 = vector.multi_reduction <maximumf>, %14, %cst_7 [1] : vector<8x8xf32> to vector<8xf32>
    %16 = vector.shape_cast %15 : vector<8xf32> to vector<8x1xf32>
    %17 = vector.broadcast %16 : vector<8x1xf32> to vector<8x8xf32>
    %18 = arith.subf %14, %17 : vector<8x8xf32>
    %19 = math.exp %18 : vector<8x8xf32>
    %cst_8 = arith.constant dense<0.000000e+00> : vector<8xf32>
    %20 = vector.multi_reduction <add>, %19, %cst_8 [1] : vector<8x8xf32> to vector<8xf32>
    %21 = vector.shape_cast %20 : vector<8xf32> to vector<8x1xf32>
    %22 = tpu.reciprocal %21 {approx = true} : vector<8x1xf32> -> vector<8x1xf32>
    %23 = vector.broadcast %22 : vector<8x1xf32> to vector<8x8xf32>
    %24 = arith.mulf %19, %23 : vector<8x8xf32>
    %25 = arith.truncf %24 : vector<8x8xf32> to vector<8x8xbf16>
    %cst_9 = arith.constant dense<0.000000e+00> : vector<8x8xf32>
    %26 = tpu.matmul %25, %10, %cst_9 {dimension_numbers = #tpu.dot_dimension_numbers<[1], [0], [0], [1], [0, 0, 1, 1], [], []>} : vector<8x8xbf16>, vector<8x8xbf16>, vector<8x8xf32> -> vector<8x8xf32>
    %27 = vector.extract_strided_slice %3 {offsets = [0, 8], sizes = [8, 8], strides = [1, 1]} : vector<8x96xf32> to vector<8x8xf32>
    %28 = arith.truncf %27 : vector<8x8xf32> to vector<8x8xbf16>
    %29 = vector.extract_strided_slice %3 {offsets = [0, 40], sizes = [8, 8], strides = [1, 1]} : vector<8x96xf32> to vector<8x8xf32>
    %30 = arith.truncf %29 : vector<8x8xf32> to vector<8x8xbf16>
    %31 = vector.extract_strided_slice %3 {offsets = [0, 72], sizes = [8, 8], strides = [1, 1]} : vector<8x96xf32> to vector<8x8xf32>
    %32 = arith.truncf %31 : vector<8x8xf32> to vector<8x8xbf16>
    %cst_10 = arith.constant dense<0.000000e+00> : vector<8x8xf32>
    %33 = tpu.matmul %28, %30, %cst_10 {dimension_numbers = #tpu.dot_dimension_numbers<[1], [1], [0], [0], [0, 0, 1, 0], [], []>} : vector<8x8xbf16>, vector<8x8xbf16>, vector<8x8xf32> -> vector<8x8xf32>
    %cst_11 = arith.constant 0.353553385 : f32
    %34 = vector.broadcast %cst_11 : f32 to vector<8x8xf32>
    %35 = arith.mulf %33, %34 : vector<8x8xf32>
    %36 = arith.addf %35, %4 : vector<8x8xf32>
    %cst_12 = arith.constant dense<0xFF800000> : vector<8xf32>
    %37 = vector.multi_reduction <maximumf>, %36, %cst_12 [1] : vector<8x8xf32> to vector<8xf32>
    %38 = vector.shape_cast %37 : vector<8xf32> to vector<8x1xf32>
    %39 = vector.broadcast %38 : vector<8x1xf32> to vector<8x8xf32>
    %40 = arith.subf %36, %39 : vector<8x8xf32>
    %41 = math.exp %40 : vector<8x8xf32>
    %cst_13 = arith.constant dense<0.000000e+00> : vector<8xf32>
    %42 = vector.multi_reduction <add>, %41, %cst_13 [1] : vector<8x8xf32> to vector<8xf32>
    %43 = vector.shape_cast %42 : vector<8xf32> to vector<8x1xf32>
    %44 = tpu.reciprocal %43 {approx = true} : vector<8x1xf32> -> vector<8x1xf32>
    %45 = vector.broadcast %44 : vector<8x1xf32> to vector<8x8xf32>
    %46 = arith.mulf %41, %45 : vector<8x8xf32>
    %47 = arith.truncf %46 : vector<8x8xf32> to vector<8x8xbf16>
    %cst_14 = arith.constant dense<0.000000e+00> : vector<8x8xf32>
    %48 = tpu.matmul %47, %32, %cst_14 {dimension_numbers = #tpu.dot_dimension_numbers<[1], [0], [0], [1], [0, 0, 1, 1], [], []>} : vector<8x8xbf16>, vector<8x8xbf16>, vector<8x8xf32> -> vector<8x8xf32>
    %49 = vector.extract_strided_slice %3 {offsets = [0, 16], sizes = [8, 8], strides = [1, 1]} : vector<8x96xf32> to vector<8x8xf32>
    %50 = arith.truncf %49 : vector<8x8xf32> to vector<8x8xbf16>
    %51 = vector.extract_strided_slice %3 {offsets = [0, 48], sizes = [8, 8], strides = [1, 1]} : vector<8x96xf32> to vector<8x8xf32>
    %52 = arith.truncf %51 : vector<8x8xf32> to vector<8x8xbf16>
    %53 = vector.extract_strided_slice %3 {offsets = [0, 80], sizes = [8, 8], strides = [1, 1]} : vector<8x96xf32> to vector<8x8xf32>
    %54 = arith.truncf %53 : vector<8x8xf32> to vector<8x8xbf16>
    %cst_15 = arith.constant dense<0.000000e+00> : vector<8x8xf32>
    %55 = tpu.matmul %50, %52, %cst_15 {dimension_numbers = #tpu.dot_dimension_numbers<[1], [1], [0], [0], [0, 0, 1, 0], [], []>} : vector<8x8xbf16>, vector<8x8xbf16>, vector<8x8xf32> -> vector<8x8xf32>
    %cst_16 = arith.constant 0.353553385 : f32
    %56 = vector.broadcast %cst_16 : f32 to vector<8x8xf32>
    %57 = arith.mulf %55, %56 : vector<8x8xf32>
    %58 = arith.addf %57, %4 : vector<8x8xf32>
    %cst_17 = arith.constant dense<0xFF800000> : vector<8xf32>
    %59 = vector.multi_reduction <maximumf>, %58, %cst_17 [1] : vector<8x8xf32> to vector<8xf32>
    %60 = vector.shape_cast %59 : vector<8xf32> to vector<8x1xf32>
    %61 = vector.broadcast %60 : vector<8x1xf32> to vector<8x8xf32>
    %62 = arith.subf %58, %61 : vector<8x8xf32>
    %63 = math.exp %62 : vector<8x8xf32>
    %cst_18 = arith.constant dense<0.000000e+00> : vector<8xf32>
    %64 = vector.multi_reduction <add>, %63, %cst_18 [1] : vector<8x8xf32> to vector<8xf32>
    %65 = vector.shape_cast %64 : vector<8xf32> to vector<8x1xf32>
    %66 = tpu.reciprocal %65 {approx = true} : vector<8x1xf32> -> vector<8x1xf32>
    %67 = vector.broadcast %66 : vector<8x1xf32> to vector<8x8xf32>
    %68 = arith.mulf %63, %67 : vector<8x8xf32>
    %69 = arith.truncf %68 : vector<8x8xf32> to vector<8x8xbf16>
    %cst_19 = arith.constant dense<0.000000e+00> : vector<8x8xf32>
    %70 = tpu.matmul %69, %54, %cst_19 {dimension_numbers = #tpu.dot_dimension_numbers<[1], [0], [0], [1], [0, 0, 1, 1], [], []>} : vector<8x8xbf16>, vector<8x8xbf16>, vector<8x8xf32> -> vector<8x8xf32>
    %71 = vector.extract_strided_slice %3 {offsets = [0, 24], sizes = [8, 8], strides = [1, 1]} : vector<8x96xf32> to vector<8x8xf32>
    %72 = arith.truncf %71 : vector<8x8xf32> to vector<8x8xbf16>
    %73 = vector.extract_strided_slice %3 {offsets = [0, 56], sizes = [8, 8], strides = [1, 1]} : vector<8x96xf32> to vector<8x8xf32>
    %74 = arith.truncf %73 : vector<8x8xf32> to vector<8x8xbf16>
    %75 = vector.extract_strided_slice %3 {offsets = [0, 88], sizes = [8, 8], strides = [1, 1]} : vector<8x96xf32> to vector<8x8xf32>
    %76 = arith.truncf %75 : vector<8x8xf32> to vector<8x8xbf16>
    %cst_20 = arith.constant dense<0.000000e+00> : vector<8x8xf32>
    %77 = tpu.matmul %72, %74, %cst_20 {dimension_numbers = #tpu.dot_dimension_numbers<[1], [1], [0], [0], [0, 0, 1, 0], [], []>} : vector<8x8xbf16>, vector<8x8xbf16>, vector<8x8xf32> -> vector<8x8xf32>
    %cst_21 = arith.constant 0.353553385 : f32
    %78 = vector.broadcast %cst_21 : f32 to vector<8x8xf32>
    %79 = arith.mulf %77, %78 : vector<8x8xf32>
    %80 = arith.addf %79, %4 : vector<8x8xf32>
    %cst_22 = arith.constant dense<0xFF800000> : vector<8xf32>
    %81 = vector.multi_reduction <maximumf>, %80, %cst_22 [1] : vector<8x8xf32> to vector<8xf32>
    %82 = vector.shape_cast %81 : vector<8xf32> to vector<8x1xf32>
    %83 = vector.broadcast %82 : vector<8x1xf32> to vector<8x8xf32>
    %84 = arith.subf %80, %83 : vector<8x8xf32>
    %85 = math.exp %84 : vector<8x8xf32>
    %cst_23 = arith.constant dense<0.000000e+00> : vector<8xf32>
    %86 = vector.multi_reduction <add>, %85, %cst_23 [1] : vector<8x8xf32> to vector<8xf32>
    %87 = vector.shape_cast %86 : vector<8xf32> to vector<8x1xf32>
    %88 = tpu.reciprocal %87 {approx = true} : vector<8x1xf32> -> vector<8x1xf32>
    %89 = vector.broadcast %88 : vector<8x1xf32> to vector<8x8xf32>
    %90 = arith.mulf %85, %89 : vector<8x8xf32>
    %91 = arith.truncf %90 : vector<8x8xf32> to vector<8x8xbf16>
    %cst_24 = arith.constant dense<0.000000e+00> : vector<8x8xf32>
    %92 = tpu.matmul %91, %76, %cst_24 {dimension_numbers = #tpu.dot_dimension_numbers<[1], [0], [0], [1], [0, 0, 1, 1], [], []>} : vector<8x8xbf16>, vector<8x8xbf16>, vector<8x8xf32> -> vector<8x8xf32>
    %93 = tpu.concatenate %26, %48, %70, %92 in 1 : vector<8x8xf32>, vector<8x8xf32>, vector<8x8xf32>, vector<8x8xf32> -> vector<8x32xf32>
    %94 = arith.truncf %93 : vector<8x32xf32> to vector<8x32xbf16>
    %c0_25 = arith.constant 0 : index
    %c0_26 = arith.constant 0 : index
    %95 = vector.load %arg3[%c0_25, %c0_26] : memref<32x32xbf16, #tpu.memory_space<vmem>>, vector<32x32xbf16>
    %cst_27 = arith.constant dense<0.000000e+00> : vector<8x32xf32>
    %96 = tpu.matmul %94, %95, %cst_27 {dimension_numbers = #tpu.dot_dimension_numbers<[1], [0], [0], [1], [0, 0, 1, 1], [], []>} : vector<8x32xbf16>, vector<32x32xbf16>, vector<8x32xf32> -> vector<8x32xf32>
    %c0_28 = arith.constant 0 : index
    %c0_29 = arith.constant 0 : index
    %97 = vector.load %arg4[%c0_28, %c0_29] : memref<1x32xf32, #tpu.memory_space<vmem>>, vector<1x32xf32>
    %98 = vector.broadcast %97 : vector<1x32xf32> to vector<8x32xf32>
    %99 = arith.addf %96, %98 : vector<8x32xf32>
    %c0_30 = arith.constant 0 : index
    %c0_31 = arith.constant 0 : index
    %100 = vector.load %arg6[%c0_30, %c0_31] : memref<8x32xf32, #tpu.memory_space<vmem>>, vector<8x32xf32>
    tpu.vector_store %arg6[%c0_30, %c0_31], %99 {strides = array<i32>} : memref<8x32xf32, #tpu.memory_space<vmem>>, vector<8x32xf32>,
    return
  }
  func.func @transform_0(%arg0: i32) -> (i32, i32) {
    %c0_i32 = arith.constant 0 : i32
    %c0_i32_0 = arith.constant 0 : i32
    return %arg0, %c0_i32 : i32, i32
  }
  func.func @transform_1(%arg0: i32) -> (i32, i32) {
    %c0_i32 = arith.constant 0 : i32
    %c0_i32_0 = arith.constant 0 : i32
    %c0_i32_1 = arith.constant 0 : i32
    return %c0_i32, %c0_i32_0 : i32, i32
  }
  func.func @transform_2(%arg0: i32) -> (i32, i32) {
    %c0_i32 = arith.constant 0 : i32
    %c0_i32_0 = arith.constant 0 : i32
    %c0_i32_1 = arith.constant 0 : i32
    return %c0_i32, %c0_i32_0 : i32, i32
  }
  func.func @transform_3(%arg0: i32) -> (i32, i32) {
    %c0_i32 = arith.constant 0 : i32
    %c0_i32_0 = arith.constant 0 : i32
    %c0_i32_1 = arith.constant 0 : i32
    return %c0_i32, %c0_i32_0 : i32, i32
  }
  func.func @transform_4(%arg0: i32) -> (i32, i32) {
    %c0_i32 = arith.constant 0 : i32
    %c0_i32_0 = arith.constant 0 : i32
    %c0_i32_1 = arith.constant 0 : i32
    return %c0_i32, %c0_i32_0 : i32, i32
  }
  func.func @transform_5(%arg0: i32) -> (i32, i32) {
    %c0_i32 = arith.constant 0 : i32
    %c0_i32_0 = arith.constant 0 : i32
    return %arg0, %c0_i32 : i32, i32
  }
}

</mosaic_0001>

<bundles_post_ra>
// kernel: tpu_custom_call.1
= control target key start
LH: loop header
LB: loop body
LE: loop exit
PB: predicated region body
PF: predicated region fallthrough
CT: control target
= control target key end

     0   :  { %10 = vsyncpa [#allocation3], 0  ;;  %s1731_s0 = inlined_call_operand.hbm [shape: f32[16,32], index: 0, kind: input, shape index: {}]   ;;  %s1732_s1 = inlined_call_operand.hbm [shape: bf16[32,96], index: 1, kind: input, shape index: {}]   ;;  %s1733_s2 = inlined_call_operand.hbm [shape: bf16[32,32], index: 2, kind: input, shape index: {}]   ;;  %s1734_s3 = inlined_call_operand.vmem [shape: f32[1,32], index: 3, kind: input, shape index: {}]   ;;  %s1735_s4 = inlined_call_operand.hbm [shape: f32[8,8], index: 4, kind: input, shape index: {}]   ;;  %s1736_s5 = inlined_call_operand.hbm [shape: f32[16,32], index: 5, kind: output, shape index: {}]  }
   0x1   :  { %12 = vsyncpa [#allocation3 + $0x1], 0 }
   0x2   :  { %13 = vsyncpa [#allocation6], 0 }
   0x3   :  { %14 = vsyncpa [#allocation9], 0 }
   0x4   :  { %15 = vsyncpa [#allocation4], 0 }
   0x5   :  { %17 = vsyncpa [#allocation4 + $0x1], 0  ;;  %s1461_s18 = smov 0   ;;  %s1463_s19 = smov 0  }
   0x6   :  { %s1465_s20 = smov 0   ;;  %s1467_s21 = smov 0  }
   0x7 LB: > { %s1482_s22 = sadd.s32 4294967295, %s1406_s21   ;;  %s994_s23 = sadd.s32 4294967294, %s1406_s21   ;;  %s1406_s21 = sphi %s1467_s21, %s1760_s21   ;;  %s1402_s20 = sphi %s1465_s20, %s1759_s20   ;;  %s1398_s19 = sphi %s1463_s19, %s1758_s19   ;;  %s1394_s18 = sphi %s1461_s18, %s1757_s18  }
   0x8   : > { %p43_p0 = scmp.ne.s32.totalorder %s1398_s19, %s1394_s18  ;;  %p1737_p1 = scmp.eq.s32.totalorder %s1482_s22, 0 }
   0x9   : > { %p157_p3 = scmp.eq.s32.totalorder %s994_s23, 1  ;;  %p995_p5 = scmp.ge.s32.totalorder %s1406_s21, 1 }
   0xa   : > { %p1491_p4 = por %p1737_p1, %p43_p0  ;;  %p164_p7 = scmp.lt.s32.totalorder %s1406_s21, 3 }
   0xb   : > { %p1496_p6 = por %p157_p3, %p43_p0  ;;  %s1408_s27 = smov [#allocation5]  }
   0xc   : > { %s1741_s24 = scalar_select %p1491_p4, 1, 0 }
   0xd   : > { %s1742_s25 = scalar_select %p1496_p6, 1, 0 }
   0xe   : > { %p1501_p8 = pnand %p995_p5, %p164_p7  ;;  %s176_s28 = sshll.u32 %s1408_s27, 4  ;;  %s177_s28 = int_to_ptr.vmem [resolvable:$true] %s176_s28 }
   0xf   : > { %s1409_s30 = smov [#allocation7]   ;;  %s1410_s7 = smov [#allocation8]  }
  0x10   : > { %s1743_s26 = scalar_select %p1501_p8, 1, 0 }
  0x11   : > { %p1129_p9 = pneg %p1501_p8  ;;  %s189_s6 = sshll.u32 %s1409_s30, 4  ;;  %s190_s6 = int_to_ptr.vmem [resolvable:$true] %s189_s6 }
  0x12   : > { %s206_s8 = sshll.u32 %s1410_s7, 4  ;;  %s1239_s9 = scalar_lea.vmem %s177_s28, 256  ;;  %s207_s8 = int_to_ptr.vmem [resolvable:$true] %s206_s8 }
  0x13   : > { %p1510_p11 = pnand %p1129_p9, %p1737_p1  ;;  %p1240_p13 = scmp.ne.s32.totalorder %s177_s28, %s1239_s9 }
  0x14   : > { %p1247_p5 = scmp.lt.s32.totalorder %s177_s28, %s177_s28  ;;  %p1248_p7 = scmp.lt.s32.totalorder %s1239_s9, %s1239_s9 }
  0x15   : > { %p1230_p12 = pneg %p1510_p11 }
  0x16   : > { %p1249_p9 = por %p1248_p7, %p1247_p5 }
  0x17   : > { %p1242_p0 = pnand %p1240_p13, %p1230_p12 }
  0x19   : > { %p1243_p3 = pneg %p1242_p0 }
  0x1b   : > { %p1250_p10 = pnand %p1249_p9, %p1243_p3 }
  0x1d   : > { %1253 = shalt.err (!%p1250_p10)
}
  0x1e   : > { %s1411_s10 = smov 64   ;;  %s1412_s11 = smov 4  }
  0x1f   : > { %1132 = dma.hbm_to_vmem [thread:$0]  (!%p1510_p11), %s1732_s1, 256, %s177_s28, [#allocation6], %s1411_s10, %s1411_s10, %s1412_s11  }
  0x20   : > { %s1265_s14 = scalar_lea.vmem %s190_s6, 256  ;;  %p1273_p2 = scmp.lt.s32.totalorder %s190_s6, %s190_s6 }
  0x21   : > { %p1266_p1 = scmp.ne.s32.totalorder %s190_s6, %s1265_s14  ;;  %p1274_p6 = scmp.lt.s32.totalorder %s1265_s14, %s1265_s14 }
  0x23   : > { %p1268_p13 = pnand %p1266_p1, %p1230_p12  ;;  %p1275_p5 = por %p1274_p6, %p1273_p2 }
  0x25   : > { %p1269_p0 = pneg %p1268_p13 }
  0x27   : > { %p1276_p3 = pnand %p1275_p5, %p1269_p0 }
  0x29   : > { %1279 = shalt.err (!%p1276_p3)
}
  0x2a   : > { %1135 = dma.hbm_to_vmem [thread:$0]  (!%p1510_p11), %s1733_s2, 256, %s190_s6, [#allocation6], %s1411_s10, %s1411_s10, %s1412_s11  }
  0x2b   : > { %s1291_s17 = scalar_lea.vmem %s207_s8, 128  ;;  %p1299_p9 = scmp.lt.s32.totalorder %s207_s8, %s207_s8 }
  0x2c   : > { %p1292_p10 = scmp.ne.s32.totalorder %s207_s8, %s1291_s17  ;;  %p1300_p13 = scmp.lt.s32.totalorder %s1291_s17, %s1291_s17 }
  0x2e   : > { %p1294_p7 = pnand %p1292_p10, %p1230_p12  ;;  %p1301_p4 = por %p1300_p13, %p1299_p9 }
  0x30   : > { %p1295_p1 = pneg %p1294_p7 }
  0x32   : > { %p1302_p2 = pnand %p1301_p4, %p1295_p1 }
  0x34   : > { %1305 = shalt.err (!%p1302_p2)
}
  0x35   : > { %1138 = dma.hbm_to_vmem [thread:$0]  (!%p1510_p11), %s1735_s4, 128, %s207_s8, [#allocation9]  }
  0x36   : > { %s1541_s28 = sadd.s32 1, %s1406_s21   ;;  %s30_s29 = sadd.s32 1, %s1402_s20 }
  0x37   : > { %s27_s30 = ssub.s32 %s1406_s21, %s1541_s28  ;;  %p37_p6 = scmp.ne.s32.totalorder %s1402_s20, %s1398_s19 }
  0x38   : > { %p28_p4 = scmp.eq.s32.totalorder %s27_s30, 0  ;;  %p38_p12 = scmp.eq.s32.totalorder %s1406_s21, 0 }
  0x39   : > { %p1150_p0 = scmp.lt.s32.totalorder %s1406_s21, 2  ;;  %p1745_p3 = scmp.eq.s32.totalorder %s1482_s22, 1 }
  0x3a   : > { %s1551_s6 = scalar_select %p28_p4, %s1402_s20, %s30_s29  }
  0x3b   : > { %p39_p5 = por %p38_p12, %p37_p6  ;;  %p1555_p10 = por %p1745_p3, %p37_p6 }
  0x3c   : > { %s217_s9 = sand.u32 1, %s1402_s20   ;;  %s1001_s10 = sshll.u32 %s1406_s21, 7 }
  0x3d   : > { %s1746_s7 = scalar_select %p1555_p10, 1, 0 }
  0x3e   : > { %s1000_s8 = sshll.u32 %s217_s9, 3  ;;  %s1564_s13 = scalar_lea.hbm %s1731_s0, %s1001_s10 }
  0x3f   : > { %s221_s14 = scalar_lea.vmem [#allocation2], %s1000_s8  ;;  %p1566_p11 = pnand %p1150_p0, %p39_p5 }
  0x40   : > { %s228_s15 = sshll.u32 %s221_s14, 4  ;;  %s218_s17 = scalar_lea.sflag [#allocation3], %s217_s9  ;;  %s229_s15 = int_to_ptr.vmem [resolvable:$true] %s228_s15 }
  0x41   : > { %s1306_s23 = scalar_lea.hbm %s1564_s13, 128  ;;  %p1308_p1 = pneg %p1566_p11 }
  0x42   : > { %p1307_p7 = scmp.ne.s32.totalorder %s1564_s13, %s1306_s23  ;;  %s1311_s29 = scalar_lea.hbm %s1731_s0, 256 }
  0x43   : > { %p1312_p2 = scmp.lt.s32.totalorder %s1564_s13, %s1731_s0  ;;  %p1313_p4 = scmp.lt.s32.totalorder %s1311_s29, %s1306_s23 }
  0x44   : > { %p1309_p9 = pnand %p1308_p1, %p1307_p7 }
  0x45   : > { %p1314_p6 = por %p1313_p4, %p1312_p2 }
  0x46   : > { %p1310_p13 = pneg %p1309_p9 }
  0x48   : > { %p1315_p12 = pnand %p1314_p6, %p1310_p13 }
  0x4a   : > { %1318 = shalt.err (!%p1315_p12)
}
  0x4b   : > { %s1319_s11 = scalar_lea.vmem %s229_s15, 128  ;;  %s1413_s9 = smov [#allocation2]  }
  0x4c   : > { %p1320_p0 = scmp.ne.s32.totalorder %s229_s15, %s1319_s11  ;;  %s1324_s12 = sshll.u32 %s1413_s9, 4  ;;  %s1325_s12 = int_to_ptr.vmem [resolvable:$false] %s1324_s12 }
  0x4d   : > { %s1326_s14 = scalar_lea.vmem %s1325_s12, 256  ;;  %p1327_p7 = scmp.lt.s32.totalorder %s229_s15, %s1325_s12 }
  0x4e   : > { %p1322_p5 = pnand %p1320_p0, %p1308_p1  ;;  %p1328_p9 = scmp.lt.s32.totalorder %s1326_s14, %s1319_s11 }
  0x50   : > { %p1323_p3 = pneg %p1322_p5  ;;  %p1329_p10 = por %p1328_p9, %p1327_p7 }
  0x52   : > { %p1330_p8 = pnand %p1329_p10, %p1323_p3 }
  0x54   : > { %1333 = shalt.err (!%p1330_p8)
}
  0x55   : > { %1142 = dma.hbm_to_vmem [thread:$0]  (!%p1566_p11), %s1564_s13, 128, %s229_s15, %s218_s17  }
  0x56   : > { %p1748_p13 = scmp.ne.s32.totalorder %s1743_s26, 0 }
  0x57   : > { %s1587_s23 = sand.u32 (!%p1748_p13), 1, %s1398_s19   ;;  %p1749_p10 = scmp.ne.s32.totalorder (!%p1748_p13), %s1741_s24, 0 }
  0x58   : > { %237 = sbr.rel (%p1748_p13) target bundleno = 1520 (0x5f0), region = 40  ;;  %s1003_s27 = sshll.u32 (!%p1748_p13), %s1587_s23, 3 }
  0x59   : > { %s240_s30 = scalar_lea.sflag (!%p1748_p13), [#allocation3], %s1587_s23  ;;  %s243_s29 = scalar_lea.vmem (!%p1748_p13), [#allocation2], %s1003_s27 }
  0x5d   : > { %1377 = dma.done.wait (%p1749_p10), %s240_s30, 128  }
  0x5e   : > { %1379 = vsyncadd (%p1749_p10), %s240_s30, 4294967168  ;;  %p1750_p8 = scmp.eq.s32.totalorder %s1482_s22, 0 }
  0x60   : > { %1381 = dma.done.wait (%p1750_p8), [#allocation6], 512   ;;  %p1751_p11 = pmov %p1750_p8 }
  0x61   : > { %p1752_p1 = pmov %p1750_p8 }
  0x62   : > { %1383 = vsyncadd (%p1751_p11), [#allocation6], 4294966784 }
  0x63   : > { %1385 = dma.done.wait (%p1752_p1), [#allocation9], 128   ;;  %p1753_p2 = pmov %p1752_p1 }
  0x64   : > { %v1414_v0 = vmov 0.0   ;;  %vm1415_vm0 = vmmov 0   ;;  %v1208_v1 = vld [vmem:[#allocation5 + $0x8] sm:$0xff]   ;;  %v1209_v2 = vld [vmem:[#allocation5] sm:$0xff]   ;;  %v283_v3 = vld [vmem:[%s243_s29] sm:$0xff]  ;;  %vm301_vm1 = vcmask 261120  }
  0x65   : > { %1387 = vsyncadd (%p1753_p2), [#allocation9], 4294967168  ;;  %1049 = vmatprep.subr.bf16.mxu0 %v1414_v0  ;;  %1053 = vmatprep.mubr.msk.bf16.mxu0 %vm1415_vm0, %v1414_v0  ;;  %v284_v4 = vpack.c.bf16 %v283_v3, %v283_v3  ;;  %s1416_s24 = smov 120   ;;  %s1417_s26 = smov 96   ;;  %vm350_vm2 = vcmask 64512   ;;  %v345_v22 = vld [vmem:[#allocation8] sm:$0xff] }
  0x66   : > { %1057 = vmatprep.subr.bf16.mxu1 %v1414_v0  ;;  %1059 = vmatprep.mubr.msk.bf16.mxu1 %vm1415_vm0, %v1414_v0  ;;  %s1418_s13 = smov 80   ;;  %s1419_s15 = smov 88   ;;  %vm416_vm3 = vcmask 1043456   ;;  %vm809_vm4 = vcmask 130048   ;;  %vm811_vm5 = vcmask 195584  }
  0x67   : > { %1050 = vmatpush3.bf16.msra.mxu0 %v1208_v1  ;;  %s1420_s16 = smov 72   ;;  %s1421_s17 = smov 112  }
  0x68   : > { %1051 = vmatprep.subr.bf16.mxu0 %v1414_v0  ;;  %s1422_s10 = smov 104   ;;  %s1423_s8 = smov 56  }
  0x69   : > { %s1424_s11 = smov 64   ;;  %s1425_s9 = smov 40  }
  0x6a   : > { %s1426_s12 = smov 48   ;;  %s1427_s14 = smov 8  }
  0x6b   : > { %1052 = vmatpush3.bf16.msra.mxu0 %v1209_v2  ;;  %s1428_s30 = smov 16   ;;  %s1429_s29 = smov 24  }
  0x6c   : > { %1063 = vmatprep.subr.bf16.mxu0 %v1414_v0  ;;  %p1754_p6 = scmp.ne.s32.totalorder %s1746_s7, 0 }
  0x6e   : > { %1054 = vmatmul.mubr.msk.bf16.vlgmr.msra.gmra.mxu0 %vm301_vm1, %v284_v4 }
  0x6f   : > { %1065 = vmatprep.mubr.msk.bf16.mxu0 %vm1415_vm0, %v1414_v0 }
 0x12e   : > { %v339_v5 = vpop.f32.mrf.mxu0 }
 0x12f   : > { %v1616_v6 = vpack.c.bf16 %v339_v5, %v339_v5 }
 0x130   : > { %v1055_v7 = vpop.f32.mrf.mxu0 }
 0x131   : > { %460 = vrot.lane.b32.xlu1 %v1616_v6, %s1416_s24  ;;  %348 = vrot.lane.b32.xlu0 %v1616_v6, %s1417_s26 }
 0x132   : > { %v342_v8 = vpop.f32.mrf.mxu0 }
 0x134   : > { %v1056_v9 = vpop.f32.mrf.mxu0 }
 0x135   : > { %574 = vrot.lane.b32.xlu1 %v1616_v6, %s1418_s13  ;;  %462 = vrot.lane.b32.xlu0 %v1616_v6, %s1419_s15  ;;  %s1024_s13 = sshll.u32 %s1482_s22, 7  ;;  %s281_s15 = scalar_lea.vmem [#allocation10], %s1003_s27 }
 0x136   : > { %s882_s22 = scalar_lea.sflag [#allocation4], %s1587_s23  ;;  %s1430_s27 = smov [#allocation10]  }
 0x139   : > { %686 = vrot.lane.b32.xlu1 %v1616_v6, %s1420_s16  ;;  %572 = vrot.lane.b32.xlu0 %v1616_v6, %s1421_s17  ;;  %s895_s16 = sshll.u32 %s281_s15, 4  ;;  %s1689_s16 = int_to_ptr.vmem [resolvable:$true] %s895_s16 }
 0x13d   : > { %684 = vrot.lane.b32.xlu0 %v1616_v6, %s1422_s10 }
 0x1a3   : > { %v349_v10 = vpop.permute.xlu0 %348  ;;  %v461_v13 = vpop.permute.xlu1 %460 }
 0x1a4   : > { %v355_v11 = vsel %vm350_vm2, %v349_v10, 0 }
 0x1a5   : > { %1058 = vmatpush3.bf16.xpose.msra.mxu1 %v355_v11 }
 0x1a6   : > { %1069 = vmatprep.subr.bf16.mxu1 %v1414_v0 }
 0x1a7   : > { %v463_v12 = vpop.permute.xlu0 %462  ;;  %v575_v15 = vpop.permute.xlu1 %574 }
 0x1a8   : > { %v468_v14 = vsel %vm350_vm2, %v463_v12, 0  ;;  %v580_v16 = vsel %vm350_vm2, %v575_v15, 0 }
 0x1ab   : > { %v687_v17 = vpop.permute.xlu1 %686  ;;  %v573_v18 = vpop.permute.xlu0 %572 }
 0x1ac   : > { %1060 = vmatmul.mubr.msk.bf16.vlgmr.msra.gmra.mxu1 %vm350_vm2, %v1616_v6  ;;  %v692_v19 = vsel %vm350_vm2, %v687_v17, 0 }
 0x1ad   : > { %1070 = vmatpush3.bf16.xpose.msra.mxu1 %v468_v14  ;;  %1071 = vmatprep.mubr.msk.bf16.mxu1 %vm1415_vm0, %v1414_v0 }
 0x1ae   : > { %1081 = vmatprep.subr.bf16.mxu1 %v1414_v0 }
 0x1af   : > { %v685_v20 = vpop.permute.xlu0 %684 }
 0x1b4   : > { %1072 = vmatmul.mubr.msk.bf16.vlgmr.msra.gmra.mxu1 %vm350_vm2, %v461_v13 }
 0x1b5   : > { %1082 = vmatpush3.bf16.xpose.msra.mxu1 %v580_v16  ;;  %1083 = vmatprep.mubr.msk.bf16.mxu1 %vm1415_vm0, %v1414_v0 }
 0x1b6   : > { %1093 = vmatprep.subr.bf16.mxu1 %v1414_v0 }
 0x1bc   : > { %1084 = vmatmul.mubr.msk.bf16.vlgmr.msra.gmra.mxu1 %vm350_vm2, %v573_v18 }
 0x1bd   : > { %1094 = vmatpush3.bf16.xpose.msra.mxu1 %v692_v19  ;;  %1095 = vmatprep.mubr.msk.bf16.mxu1 %vm1415_vm0, %v1414_v0 }
 0x1be   : > { %1105 = vmatprep.subr.bf16.mxu1 %v1414_v0 }
 0x1c4   : > { %1096 = vmatmul.mubr.msk.bf16.vlgmr.msra.gmra.mxu1 %vm350_vm2, %v685_v20 }
 0x1c5   : > { %1109 = vmatprep.mubr.msk.bf16.mxu1 %vm1415_vm0, %v1414_v0 }
 0x26c   : > { %v391_v21 = vpop.f32.mrf.mxu1 }
 0x26d   : > { %v397_v23 = vmul.f32 0.35355338, %v391_v21 }
 0x26e   : > { %v1061_v24 = vpop.f32.mrf.mxu1 }
 0x26f   : > { %v398_v25 = vadd.f32 %v397_v23, %v345_v22 }
 0x270   : > { %v394_v26 = vpop.f32.mrf.mxu1 }
 0x271   : > { %v399_v27 = vsel %vm350_vm2, %v398_v25, -inf }
 0x272   : > { %400 = vmax.xlane.f32.xlu1 %v399_v27  ;;  %v1062_v28 = vpop.f32.mrf.mxu1 }
 0x274   : > { %v504_v29 = vpop.f32.mrf.mxu1 }
 0x275   : > { %v510_v30 = vmul.f32 0.35355338, %v504_v29 }
 0x276   : > { %v1073_v31 = vpop.f32.mrf.mxu1 }
 0x277   : > { %v511_v32 = vadd.f32 %v510_v30, %v345_v22 }
 0x278   : > { %v507_v33 = vpop.f32.mrf.mxu1 }
 0x279   : > { %v512_v34 = vsel %vm350_vm2, %v511_v32, -inf }
 0x27a   : > { %513 = vmax.xlane.f32.xlu0 %v512_v34  ;;  %v1074_v35 = vpop.f32.mrf.mxu1 }
 0x27c   : > { %v616_v36 = vpop.f32.mrf.mxu1 }
 0x27d   : > { %v622_v37 = vmul.f32 0.35355338, %v616_v36 }
 0x27e   : > { %v1085_v38 = vpop.f32.mrf.mxu1 }
 0x27f   : > { %v623_v39 = vadd.f32 %v622_v37, %v345_v22 }
 0x280   : > { %v619_v40 = vpop.f32.mrf.mxu1 }
 0x281   : > { %v624_v41 = vsel %vm350_vm2, %v623_v39, -inf  ;;  %v1211_v40 = vld [vmem:[#allocation7] sm:$0xff]  }
 0x282   : > { %625 = vmax.xlane.f32.xlu0 %v624_v41  ;;  %v1086_v42 = vpop.f32.mrf.mxu1 }
 0x284   : > { %v728_v43 = vpop.f32.mrf.mxu1 }
 0x285   : > { %v734_v44 = vmul.f32 0.35355338, %v728_v43 }
 0x286   : > { %v1097_v45 = vpop.f32.mrf.mxu1 }
 0x287   : > { %v735_v46 = vadd.f32 %v734_v44, %v345_v22 }
 0x288   : > { %v731_v47 = vpop.f32.mrf.mxu1 }
 0x289   : > { %v736_v48 = vsel %vm350_vm2, %v735_v46, -inf }
 0x28a   : > { %737 = vmax.xlane.f32.xlu1 %v736_v48  ;;  %v1098_v49 = vpop.f32.mrf.mxu1 }
 0x2fb   : > { %v401_v50 = vpop.xlane.xlu1 %400 }
 0x2fc   : > { %v402_v51 = vsub.f32 %v398_v25, %v401_v50 }
 0x2fe   : > { %v403_v52 = vmul.f32 1.442695, %v402_v51 }
 0x300   : > { %1212 = vpow2.f32 %v403_v52 }
 0x303   : > { %v514_v53 = vpop.xlane.xlu0 %513 }
 0x304   : > { %v515_v54 = vsub.f32 %v511_v32, %v514_v53 }
 0x306   : > { %v516_v55 = vmul.f32 1.442695, %v515_v54 }
 0x308   : > { %1214 = vpow2.f32 %v516_v55  ;;  %v1019_v55 = vld [vmem:[%s1734_s3] ss:$0 sm:$0xff] }
 0x30b   : > { %v626_v56 = vpop.xlane.xlu0 %625 }
 0x30c   : > { %v627_v57 = vsub.f32 %v623_v39, %v626_v56  ;;  %v1210_v39 = vld [vmem:[#allocation7 + $0x8] sm:$0xff]  }
 0x30d   : > { %v1213_v58 = vpop.eup %1212  ;;  %1106 = vmatpush3.bf16.msra.mxu1 %v1210_v39 }
 0x30e   : > { %v628_v59 = vmul.f32 1.442695, %v627_v57  ;;  %v405_v60 = vsel %vm350_vm2, %v1213_v58, 0.0  ;;  %1107 = vmatprep.subr.bf16.mxu1 %v1414_v0 }
 0x30f   : > { %406 = vadd.xlane.f32.xlu0 %v405_v60 }
 0x310   : > { %1216 = vpow2.f32 %v628_v59 }
 0x311   : > { %1108 = vmatpush3.bf16.msra.mxu1 %v1211_v40 }
 0x313   : > { %v738_v2 = vpop.xlane.xlu1 %737 }
 0x314   : > { %v739_v3 = vsub.f32 %v735_v46, %v738_v2 }
 0x315   : > { %v1215_v61 = vpop.eup %1214 }
 0x316   : > { %v518_v62 = vsel %vm350_vm2, %v1215_v61, 0.0  ;;  %v740_v4 = vmul.f32 1.442695, %v739_v3 }
 0x317   : > { %519 = vadd.xlane.f32.xlu1 %v518_v62 }
 0x318   : > { %1218 = vpow2.f32 %v740_v4 }
 0x31d   : > { %v1217_v63 = vpop.eup %1216 }
 0x31e   : > { %v630_v1 = vsel %vm350_vm2, %v1217_v63, 0.0 }
 0x31f   : > { %631 = vadd.xlane.f32.xlu0 %v630_v1 }
 0x325   : > { %v1219_v5 = vpop.eup %1218 }
 0x326   : > { %v742_v7 = vsel %vm350_vm2, %v1219_v5, 0.0 }
 0x328   : > { %524 = vrot.lane.b32.xlu1 %v1616_v6, %s1423_s8  ;;  %s1687_s8 = scalar_lea.hbm %s1736_s5, %s1024_s13 }
 0x335   : > { %411 = vrot.lane.b32.xlu0 %v1616_v6, %s1424_s11  ;;  %s1334_s11 = scalar_lea.vmem %s1689_s16, 128 }
 0x336   : > { %p1335_p4 = scmp.ne.s32.totalorder %s1689_s16, %s1334_s11 }
 0x338   : > { %p1336_p12 = pnand %p1335_p4, %p1754_p6 }
 0x339   : > { %748 = vrot.lane.b32.xlu0 %v1616_v6, %s1425_s9  ;;  %s1338_s9 = sshll.u32 %s1430_s27, 4  ;;  %s1339_s9 = int_to_ptr.vmem [resolvable:$false] %s1338_s9 }
 0x33a   : > { %p1337_p0 = pneg %p1336_p12  ;;  %p1341_p5 = scmp.lt.s32.totalorder %s1689_s16, %s1339_s9 }
 0x34c   : > { %743 = vadd.xlane.f32.xlu1 %v742_v7 }
 0x35d   : > { %636 = vrot.lane.b32.xlu1 %v1616_v6, %s1426_s12  ;;  %s1340_s12 = scalar_lea.vmem %s1339_s9, 256 }
 0x35e   : > { %p1342_p3 = scmp.lt.s32.totalorder %s1340_s12, %s1334_s11 }
 0x360   : > { %p1343_p7 = por %p1342_p3, %p1341_p5 }
 0x362   : > { %p1344_p9 = pnand %p1343_p7, %p1337_p0 }
 0x398   : > { %v407_v8 = vpop.xlane.xlu0 %406 }
 0x399   : > { %1220 = vrcp.f32 %v407_v8 }
 0x3a0   : > { %v520_v9 = vpop.xlane.xlu1 %519 }
 0x3a1   : > { %1222 = vrcp.f32 %v520_v9 }
 0x3a4   : > { %v525_v15 = vpop.permute.xlu1 %524 }
 0x3a5   : > { %v530_v18 = vsel %vm416_vm3, %v525_v15, 0 }
 0x3a6   : > { %v1221_v10 = vpop.eup %1220 }
 0x3a7   : > { %v409_v12 = vmul.f32 %v1221_v10, %v1213_v58 }
 0x3a8   : > { %v632_v11 = vpop.xlane.xlu0 %631 }
 0x3a9   : > { %v410_v16 = vpack.c.bf16 %v409_v12, %v409_v12  ;;  %1224 = vrcp.f32 %v632_v11 }
 0x3ac   : > { %v412_v13 = vpop.permute.xlu0 %411 }
 0x3ad   : > { %v418_v14 = vsel %vm416_vm3, %v412_v13, 0 }
 0x3ae   : > { %1064 = vmatpush3.bf16.msra.mxu0 %v418_v14  ;;  %v1223_v17 = vpop.eup %1222 }
 0x3af   : > { %1075 = vmatprep.subr.bf16.mxu0 %v1414_v0  ;;  %v522_v6 = vmul.f32 %v1223_v17, %v1215_v61 }
 0x3b0   : > { %v749_v25 = vpop.permute.xlu0 %748 }
 0x3b1   : > { %1066 = vmatmul.mubr.msk.bf16.vlgmr.msra.gmra.mxu0 %vm350_vm2, %v410_v16  ;;  %v523_v19 = vpack.c.bf16 %v522_v6, %v522_v6  ;;  %v754_v27 = vsel %vm416_vm3, %v749_v25, 0 }
 0x3b2   : > { %1076 = vmatpush3.bf16.msra.mxu0 %v530_v18  ;;  %1077 = vmatprep.mubr.msk.bf16.mxu0 %vm1415_vm0, %v1414_v0 }
 0x3b3   : > { %1087 = vmatprep.subr.bf16.mxu0 %v1414_v0 }
 0x3b6   : > { %v1225_v20 = vpop.eup %1224 }
 0x3b7   : > { %v634_v22 = vmul.f32 %v1225_v20, %v1217_v63 }
 0x3b9   : > { %1078 = vmatmul.mubr.msk.bf16.vlgmr.msra.gmra.mxu0 %vm350_vm2, %v523_v19  ;;  %v635_v26 = vpack.c.bf16 %v634_v22, %v634_v22 }
 0x3ba   : > { %1089 = vmatprep.mubr.msk.bf16.mxu0 %vm1415_vm0, %v1414_v0 }
 0x3d5   : > { %v744_v21 = vpop.xlane.xlu1 %743 }
 0x3d6   : > { %1226 = vrcp.f32 %v744_v21 }
 0x3d9   : > { %v637_v23 = vpop.permute.xlu1 %636 }
 0x3da   : > { %v642_v24 = vsel %vm416_vm3, %v637_v23, 0 }
 0x3db   : > { %1088 = vmatpush3.bf16.msra.mxu0 %v642_v24 }
 0x3dc   : > { %1099 = vmatprep.subr.bf16.mxu0 %v1414_v0 }
 0x3de   : > { %1090 = vmatmul.mubr.msk.bf16.vlgmr.msra.gmra.mxu0 %vm350_vm2, %v635_v26 }
 0x3df   : > { %1100 = vmatpush3.bf16.msra.mxu0 %v754_v27  ;;  %1101 = vmatprep.mubr.msk.bf16.mxu0 %vm1415_vm0, %v1414_v0 }
 0x3e3   : > { %v1227_v28 = vpop.eup %1226 }
 0x3e4   : > { %v746_v29 = vmul.f32 %v1227_v28, %v1219_v5 }
 0x3e6   : > { %v747_v30 = vpack.c.bf16 %v746_v29, %v746_v29 }
 0x3e8   : > { %1102 = vmatmul.mubr.msk.bf16.vlgmr.msra.gmra.mxu0 %vm350_vm2, %v747_v30 }
 0x471   : > { %v454_v31 = vpop.f32.mrf.mxu0 }
 0x473   : > { %v1067_v32 = vpop.f32.mrf.mxu0 }
 0x475   : > { %v457_v33 = vpop.f32.mrf.mxu0 }
 0x477   : > { %v1068_v34 = vpop.f32.mrf.mxu0 }
 0x479   : > { %v566_v35 = vpop.f32.mrf.mxu0 }
 0x47a   : > { %797 = vrot.lane.b32.xlu1 %v566_v35, %s1427_s14 }
 0x47b   : > { %v1079_v36 = vpop.f32.mrf.mxu0 }
 0x47d   : > { %v569_v37 = vpop.f32.mrf.mxu0 }
 0x47f   : > { %v1080_v38 = vpop.f32.mrf.mxu0 }
 0x49e   : > { %v678_v41 = vpop.f32.mrf.mxu0 }
 0x49f   : > { %801 = vrot.lane.b32.xlu0 %v678_v41, %s1428_s30 }
 0x4a0   : > { %v1091_v42 = vpop.f32.mrf.mxu0 }
 0x4a2   : > { %v681_v43 = vpop.f32.mrf.mxu0 }
 0x4a4   : > { %v1092_v44 = vpop.f32.mrf.mxu0 }
 0x4a8   : > { %v790_v45 = vpop.f32.mrf.mxu0 }
 0x4a9   : > { %805 = vrot.lane.b32.xlu1 %v790_v45, %s1429_s29 }
 0x4aa   : > { %v1103_v46 = vpop.f32.mrf.mxu0 }
 0x4ac   : > { %v793_v47 = vpop.f32.mrf.mxu0 }
 0x4ae   : > { %v1104_v48 = vpop.f32.mrf.mxu0 }
 0x4ec   : > { %v798_v49 = vpop.permute.xlu1 %797 }
 0x4ed   : > { %v808_v0 = vsel %vm350_vm2, %v454_v31, %v798_v49 }
 0x511   : > { %v802_v50 = vpop.permute.xlu0 %801 }
 0x512   : > { %v810_v51 = vsel %vm809_vm4, %v808_v0, %v802_v50 }
 0x51b   : > { %v806_v52 = vpop.permute.xlu1 %805 }
 0x51c   : > { %v812_v53 = vsel %vm811_vm5, %v810_v51, %v806_v52 }
 0x51d   : > { %v813_v54 = vpack.c.bf16 %v812_v53, %v812_v53 }
 0x51f   : > { %1110 = vmatmul.mubr.msk.bf16.vlgmr.msra.gmra.mxu1 %vm301_vm1, %v813_v54 }
 0x5df   : > { %v874_v56 = vpop.f32.mrf.mxu1 }
 0x5e0   : > { %v875_v57 = vadd.f32 %v1019_v55, %v874_v56 }
 0x5e1   : > { %v1111_v58 = vpop.f32.mrf.mxu1 }
 0x5e2   : > { %880 = vst.msk [vmem:[%s281_s15] sm:$0xff] %vm301_vm1, %v875_v57 }
 0x5e3   : > { %v877_v59 = vpop.f32.mrf.mxu1 }
 0x5e4   : > { %1347 = shalt.err (!%p1344_p9)
}
 0x5e5   : > { %s1348_s14 = scalar_lea.hbm %s1687_s8, 128  ;;  %s1352_s29 = scalar_lea.hbm %s1736_s5, 256 }
 0x5e6   : > { %p1349_p13 = scmp.ne.s32.totalorder %s1687_s8, %s1348_s14  ;;  %p1353_p11 = scmp.lt.s32.totalorder %s1687_s8, %s1736_s5 }
 0x5e7   : > { %p1354_p1 = scmp.lt.s32.totalorder %s1352_s29, %s1348_s14 }
 0x5e8   : > { %p1350_p10 = pnand %p1349_p13, %p1754_p6 }
 0x5e9   : > { %p1355_p2 = por %p1354_p1, %p1353_p11 }
 0x5ea   : > { %p1351_p8 = pneg %p1350_p10 }
 0x5ec   : > { %p1356_p4 = pnand %p1355_p2, %p1351_p8 }
 0x5ee   : > { %1359 = shalt.err (!%p1356_p4)
}
 0x5ef   : > { %1127 = dma.vmem_to_hbm [thread:$0]  (%p1754_p6), %s1689_s16, 128, %s1687_s8, %s882_s22   ;;  %v1112_v60 = vpop.f32.mrf.mxu1 }
 0x5f0 PF: > { %s907_s13 = sand.u32 1, %s1394_s18   ;;  %p1755_p12 = scmp.ne.s32.totalorder %s1742_s25, 0 }
 0x5f1   : > { %p1756_p0 = scmp.ge.s32.totalorder %s1406_s21, 2  ;;  %s908_s15 = scalar_lea.sflag [#allocation4], %s907_s13 }
 0x5f3   : > { %p1144_p5 = pnand %p1756_p0, %p1755_p12 }
 0x5f5   : > { %p1145_p3 = pneg %p1144_p5 }
 0x5f7   : > { %1389 = dma.done.wait (%p1145_p3), %s908_s15, 128  }
 0x5f8   : > { %1391 = vsyncadd (%p1145_p3), %s908_s15, 4294967168  ;;  %p20_p7 = scmp.ge.s32.totalorder %s1541_s28, 4   ;;  %s1757_s18 = smov %s1398_s19 }
 0x5f9   : > { %s1758_s19 = smov %s1402_s20  ;;  %s1759_s20 = smov %s1551_s6 }
 0x5fa   : > { %s1760_s21 = smov %s1541_s28  ;;  %22 = sbr.rel (!%p20_p7) target bundleno = 7 (0x7), region = 97 }
 0x5ff   :  { %913 = vsyncpa [#allocation3], 1 }
 0x600   :  { %915 = vsyncpa [#allocation3 + $0x1], 1 }
 0x601   :  { %916 = vsyncpa [#allocation6], 1 }
 0x602   :  { %917 = vsyncpa [#allocation9], 1 }
 0x603   :  { %918 = vsyncpa [#allocation4], 1 }
 0x604   :  { %920 = vsyncpa [#allocation4 + $0x1], 1 }

</bundles_post_ra>
